<compile_context>
chip_gen: v7x
topology: tpu7x:2x2x1
jax: 0.10.0
libtpu: 0.0.40
codegen_flags: <defaults>
</compile_context>

<pallas_src>
import functools

import jax
import jax.numpy as jnp
from jax.experimental import pallas as pl
from jax.experimental.pallas import tpu as pltpu


def _erf_exact(z):
    """Abramowitz & Stegun 7.1.26 erf (max abs error ~1.5e-7), f32 in/out.

    Uses only ops with guaranteed Mosaic lowerings (mul/add/div/exp/abs/where).
    """
    a1, a2, a3, a4, a5 = (0.254829592, -0.284496736, 1.421413741,
                          -1.453152027, 1.061405429)
    p = 0.3275911
    sign = jnp.where(z < 0.0, -1.0, 1.0).astype(z.dtype)
    az = jnp.abs(z)
    t = 1.0 / (1.0 + p * az)
    poly = ((((a5 * t + a4) * t + a3) * t + a2) * t + a1) * t
    return sign * (1.0 - poly * jnp.exp(-az * az))


def _gelu_exact(x):
    # PyTorch F.gelu default (erf form), not the tanh approximation.
    return 0.5 * x * (1.0 + _erf_exact(x * 0.7071067811865476))


def _nonlinear_head_kernel(x_ref, w1_ref, b1_ref, w2_ref, b2_ref, o_ref):
    # x_ref  : [rows, f*D_in]
    # w1_ref : [f*D_in, f*H]      (block-diagonal when f > 1)
    # b1_ref : [1, f*H]
    # w2_ref : [f*H, f*D_out]
    # b2_ref : [1, f*D_out]
    # o_ref  : [rows, f*D_out]
    x = x_ref[...]
    h = jnp.dot(x, w1_ref[...], preferred_element_type=jnp.float32) + b1_ref[...]
    h = _gelu_exact(h)
    h = h.astype(w2_ref.dtype)
    y = jnp.dot(h, w2_ref[...], preferred_element_type=jnp.float32) + b2_ref[...]
    o_ref[...] = y.astype(o_ref.dtype)


def _round_up(a, b):
    return ((a + b - 1) // b) * b


@functools.partial(jax.jit, static_argnames=("tm", "compute_dtype"))
def nonlinear_head(x, w1, b1, w2, b2, *, tm=None, compute_dtype=None):
    """x: [..., input_dim] -> gelu(x @ w1 + b1) @ w2 + b2 : [..., out_dim].

    Weights are stored as [in_features, out_features] (transposed vs. nn.Linear).
    """
    orig_shape = x.shape
    d_in = orig_shape[-1]
    hidden = w1.shape[1]
    d_out = w2.shape[1]
    out_dtype = x.dtype

    x2d = x.reshape(-1, d_in)
    m = x2d.shape[0]

    if compute_dtype is not None:
        x2d = x2d.astype(compute_dtype)
        w1 = w1.astype(compute_dtype)
        w2 = w2.astype(compute_dtype)

    # ---- lane-density fold: pack f consecutive rows into one kernel row ----
    f = 1
    if d_out < 128 and 128 % d_out == 0 and 128 // d_out <= 16:
        f = 128 // d_out
    row_gran = 8 * f  # sublane (8) alignment measured in original rows

    if f > 1:
        w1b = jnp.kron(jnp.eye(f, dtype=w1.dtype), w1)      # [f*d_in, f*hidden]
        w2b = jnp.kron(jnp.eye(f, dtype=w2.dtype), w2)      # [f*hidden, f*d_out]
        b1b = jnp.tile(b1.reshape(1, hidden), (1, f))        # [1, f*hidden]
        b2b = jnp.tile(b2.reshape(1, d_out), (1, f))         # [1, f*d_out]
    else:
        w1b, w2b = w1, w2
        b1b = b1.reshape(1, hidden)
        b2b = b2.reshape(1, d_out)

    # ---- choose the row tile (in original rows) ----
    in_isz = jnp.dtype(x2d.dtype).itemsize
    out_isz = jnp.dtype(out_dtype).itemsize
    w_isz = jnp.dtype(w1b.dtype).itemsize
    bytes_per_row = d_in * in_isz + d_out * out_isz
    w_bytes = 2 * (w1b.size + w2b.size + b1b.size + b2b.size) * w_isz  # dbl-buffered
    vmem_budget = 20 * 1024 * 1024
    tm_cap = (vmem_budget - w_bytes) // max(2 * bytes_per_row, 1)      # dbl-buffered IO
    tm_cap = max(row_gran, (int(tm_cap) // row_gran) * row_gran)

    if tm is None:
        # Aim for >= ~2 MiB of x+out traffic per grid step.
        tm = _round_up(max((2 * 1024 * 1024) // max(bytes_per_row, 1), 1), row_gran)
    tm_eff = max(row_gran, min(int(tm), tm_cap))
    tm_eff = max(row_gran, (tm_eff // row_gran) * row_gran)

    # Pad rows only to the sublane/fold granularity; ragged final grid block
    # is handled by Pallas (rows are independent, so stale pad data is harmless).
    m_pad = _round_up(max(m, 1), row_gran)
    if m_pad != m:
        x2d = jnp.pad(x2d, ((0, m_pad - m), (0, 0)))

    # wrapper-side fold of rows into lanes (row-major contiguous -> free reshape)
    x_slab = x2d.reshape(m_pad // f, f * d_in)
    m_rows = m_pad // f                      # kernel rows (multiple of 8)
    rows = min(tm_eff // f, m_rows)          # kernel tile rows (multiple of 8)

    # keep >=2 grid steps when there is enough work (v7x: 2 TCs share the grid)
    if pl.cdiv(m_rows, rows) == 1 and m_rows > 8:
        rows = max(8, _round_up(-(-m_rows // 2), 8))
    grid_m = pl.cdiv(m_rows, rows)

    out_slab = pl.pallas_call(
        _nonlinear_head_kernel,
        out_shape=jax.ShapeDtypeStruct((m_rows, f * d_out), out_dtype),
        grid_spec=pltpu.PrefetchScalarGridSpec(
            num_scalar_prefetch=0,
            grid=(grid_m,),
            in_specs=[
                pl.BlockSpec((rows, f * d_in), lambda i: (i, 0)),         # x tile
                pl.BlockSpec((f * d_in, f * hidden), lambda i: (0, 0)),   # w1 (resident)
                pl.BlockSpec((1, f * hidden), lambda i: (0, 0)),          # b1
                pl.BlockSpec((f * hidden, f * d_out), lambda i: (0, 0)),  # w2 (resident)
                pl.BlockSpec((1, f * d_out), lambda i: (0, 0)),           # b2
            ],
            out_specs=pl.BlockSpec((rows, f * d_out), lambda i: (i, 0)),
        ),
        compiler_params=pltpu.CompilerParams(
            dimension_semantics=("parallel",),
            vmem_limit_bytes=32 * 1024 * 1024,
        ),
    )(x_slab, w1b, b1b, w2b, b2b)

    out = out_slab.reshape(m_pad, d_out)[:m]
    return out.reshape(*orig_shape[:-1], d_out)


if __name__ == "__main__":
    # NonLinearHead(input_dim=32, out_dim=16, activation_fn="gelu");
    # hidden defaults to input_dim when not given.
    # batch*seq = 18 is deliberately NOT sublane-aligned -> exercises padding
    # and the ragged-tile path.
    input_dim, hidden, out_dim = 32, 32, 16
    batch, seq = 2, 9

    key = jax.random.PRNGKey(0)
    kx, kw1, kb1, kw2, kb2 = jax.random.split(key, 5)

    x = jax.random.normal(kx, (batch, seq, input_dim), dtype=jnp.float32)

    # Synthetic params; shapes match nn.Linear but stored transposed so the
    # kernel computes x @ W + b.
    w1 = jax.random.normal(kw1, (input_dim, hidden), dtype=jnp.float32) * 0.05
    b1 = jax.random.normal(kb1, (hidden,), dtype=jnp.float32) * 0.01
    w2 = jax.random.normal(kw2, (hidden, out_dim), dtype=jnp.float32) * 0.05
    b2 = jax.random.normal(kb2, (out_dim,), dtype=jnp.float32) * 0.01

    y = nonlinear_head(x, w1, b1, w2, b2)
    jax.block_until_ready(y)

    # Pure-JAX reference (exact erf GELU == PyTorch F.gelu default).
    ref = jax.nn.gelu(x @ w1 + b1, approximate=False) @ w2 + b2
    assert y.shape == (batch, seq, out_dim)
    err = float(jnp.max(jnp.abs(y - ref)))
    assert jnp.allclose(y, ref, atol=1e-5, rtol=1e-5), err

    print("KERNEL_OK")
</pallas_src>

<mosaic_0001>
module attributes {stable_mosaic.version = 11 : i64} {
  func.func @_nonlinear_head_kernel(%arg0: i32, %arg1: memref<8x256xf32, #tpu.memory_space<vmem>>, %arg2: memref<256x256xf32, #tpu.memory_space<vmem>>, %arg3: memref<1x256xf32, #tpu.memory_space<vmem>>, %arg4: memref<256x128xf32, #tpu.memory_space<vmem>>, %arg5: memref<1x128xf32, #tpu.memory_space<vmem>>, %arg6: memref<8x128xf32, #tpu.memory_space<vmem>>) attributes {dimension_semantics = [#tpu.dimension_semantics<parallel>], iteration_bounds = array<i64: 1>, scalar_prefetch = 0 : i64, scratch_operands = 0 : i64, tpu.core_type = #tpu.core_type<tc>, window_params = [{transform_indices = @transform_0, window_bounds = array<i64: 8, 256>}, {pipeline_mode = #tpu.pipeline_mode<synchronous>, transform_indices = @transform_1, window_bounds = array<i64: 256, 256>}, {pipeline_mode = #tpu.pipeline_mode<synchronous>, transform_indices = @transform_2, window_bounds = array<i64: 1, 256>}, {pipeline_mode = #tpu.pipeline_mode<synchronous>, transform_indices = @transform_3, window_bounds = array<i64: 256, 128>}, {pipeline_mode = #tpu.pipeline_mode<synchronous>, transform_indices = @transform_4, window_bounds = array<i64: 1, 128>}, {transform_indices = @transform_5, window_bounds = array<i64: 8, 128>}]} {
    %c0 = arith.constant 0 : index
    %c0_0 = arith.constant 0 : index
    %0 = vector.load %arg1[%c0, %c0_0] : memref<8x256xf32, #tpu.memory_space<vmem>>, vector<8x256xf32>
    %c0_1 = arith.constant 0 : index
    %c0_2 = arith.constant 0 : index
    %1 = vector.load %arg2[%c0_1, %c0_2] : memref<256x256xf32, #tpu.memory_space<vmem>>, vector<256x256xf32>
    %cst = arith.constant dense<0.000000e+00> : vector<8x256xf32>
    %2 = tpu.matmul %0, %1, %cst {dimension_numbers = #tpu.dot_dimension_numbers<[1], [0], [0], [1], [0, 0, 1, 1], [], []>} : vector<8x256xf32>, vector<256x256xf32>, vector<8x256xf32> -> vector<8x256xf32>
    %c0_3 = arith.constant 0 : index
    %c0_4 = arith.constant 0 : index
    %3 = vector.load %arg3[%c0_3, %c0_4] : memref<1x256xf32, #tpu.memory_space<vmem>>, vector<1x256xf32>
    %4 = vector.broadcast %3 : vector<1x256xf32> to vector<8x256xf32>
    %5 = arith.addf %2, %4 : vector<8x256xf32>
    %cst_5 = arith.constant 5.000000e-01 : f32
    %6 = vector.broadcast %cst_5 : f32 to vector<8x256xf32>
    %7 = arith.mulf %6, %5 : vector<8x256xf32>
    %cst_6 = arith.constant 0.707106769 : f32
    %8 = vector.broadcast %cst_6 : f32 to vector<8x256xf32>
    %9 = arith.mulf %5, %8 : vector<8x256xf32>
    %cst_7 = arith.constant 0.000000e+00 : f32
    %10 = vector.broadcast %cst_7 : f32 to vector<8x256xf32>
    %11 = arith.cmpf olt, %9, %10 : vector<8x256xf32>
    %cst_8 = arith.constant -1.000000e+00 : f32
    %cst_9 = arith.constant 1.000000e+00 : f32
    %12 = vector.broadcast %cst_8 : f32 to vector<8x256xf32>
    %13 = vector.broadcast %cst_9 : f32 to vector<8x256xf32>
    %14 = arith.select %11, %12, %13 : vector<8x256xi1>, vector<8x256xf32>
    %15 = math.absf %9 : vector<8x256xf32>
    %cst_10 = arith.constant 0.327591091 : f32
    %16 = vector.broadcast %cst_10 : f32 to vector<8x256xf32>
    %17 = arith.mulf %16, %15 : vector<8x256xf32>
    %cst_11 = arith.constant 1.000000e+00 : f32
    %18 = vector.broadcast %cst_11 : f32 to vector<8x256xf32>
    %19 = arith.addf %18, %17 : vector<8x256xf32>
    %cst_12 = arith.constant 1.000000e+00 : f32
    %20 = vector.broadcast %cst_12 : f32 to vector<8x256xf32>
    %21 = arith.divf %20, %19 : vector<8x256xf32>
    %cst_13 = arith.constant 1.06140542 : f32
    %22 = vector.broadcast %cst_13 : f32 to vector<8x256xf32>
    %23 = arith.mulf %22, %21 : vector<8x256xf32>
    %cst_14 = arith.constant -1.45315206 : f32
    %24 = vector.broadcast %cst_14 : f32 to vector<8x256xf32>
    %25 = arith.addf %23, %24 : vector<8x256xf32>
    %26 = arith.mulf %25, %21 : vector<8x256xf32>
    %cst_15 = arith.constant 1.42141378 : f32
    %27 = vector.broadcast %cst_15 : f32 to vector<8x256xf32>
    %28 = arith.addf %26, %27 : vector<8x256xf32>
    %29 = arith.mulf %28, %21 : vector<8x256xf32>
    %cst_16 = arith.constant -0.284496725 : f32
    %30 = vector.broadcast %cst_16 : f32 to vector<8x256xf32>
    %31 = arith.addf %29, %30 : vector<8x256xf32>
    %32 = arith.mulf %31, %21 : vector<8x256xf32>
    %cst_17 = arith.constant 0.254829586 : f32
    %33 = vector.broadcast %cst_17 : f32 to vector<8x256xf32>
    %34 = arith.addf %32, %33 : vector<8x256xf32>
    %35 = arith.mulf %34, %21 : vector<8x256xf32>
    %cst_18 = arith.constant 0.000000e+00 : f32
    %36 = vector.broadcast %cst_18 : f32 to vector<8x256xf32>
    %37 = arith.subf %36, %15 : vector<8x256xf32>
    %38 = arith.mulf %37, %15 : vector<8x256xf32>
    %39 = math.exp %38 : vector<8x256xf32>
    %40 = arith.mulf %35, %39 : vector<8x256xf32>
    %cst_19 = arith.constant 1.000000e+00 : f32
    %41 = vector.broadcast %cst_19 : f32 to vector<8x256xf32>
    %42 = arith.subf %41, %40 : vector<8x256xf32>
    %43 = arith.mulf %14, %42 : vector<8x256xf32>
    %cst_20 = arith.constant 1.000000e+00 : f32
    %44 = vector.broadcast %cst_20 : f32 to vector<8x256xf32>
    %45 = arith.addf %44, %43 : vector<8x256xf32>
    %46 = arith.mulf %7, %45 : vector<8x256xf32>
    %c0_21 = arith.constant 0 : index
    %c0_22 = arith.constant 0 : index
    %47 = vector.load %arg4[%c0_21, %c0_22] : memref<256x128xf32, #tpu.memory_space<vmem>>, vector<256x128xf32>
    %cst_23 = arith.constant dense<0.000000e+00> : vector<8x128xf32>
    %48 = tpu.matmul %46, %47, %cst_23 {dimension_numbers = #tpu.dot_dimension_numbers<[1], [0], [0], [1], [0, 0, 1, 1], [], []>} : vector<8x256xf32>, vector<256x128xf32>, vector<8x128xf32> -> vector<8x128xf32>
    %c0_24 = arith.constant 0 : index
    %c0_25 = arith.constant 0 : index
    %49 = vector.load %arg5[%c0_24, %c0_25] : memref<1x128xf32, #tpu.memory_space<vmem>>, vector<1x128xf32>
    %50 = vector.broadcast %49 : vector<1x128xf32> to vector<8x128xf32>
    %51 = arith.addf %48, %50 : vector<8x128xf32>
    %c0_26 = arith.constant 0 : index
    %c0_27 = arith.constant 0 : index
    %52 = vector.load %arg6[%c0_26, %c0_27] : memref<8x128xf32, #tpu.memory_space<vmem>>, vector<8x128xf32>
    tpu.vector_store %arg6[%c0_26, %c0_27], %51 {strides = array<i32>} : memref<8x128xf32, #tpu.memory_space<vmem>>, vector<8x128xf32>,
    return
  }
  func.func @transform_0(%arg0: i32) -> (i32, i32) {
    %c0_i32 = arith.constant 0 : i32
    %c0_i32_0 = arith.constant 0 : i32
    return %arg0, %c0_i32 : i32, i32
  }
  func.func @transform_1(%arg0: i32) -> (i32, i32) {
    %c0_i32 = arith.constant 0 : i32
    %c0_i32_0 = arith.constant 0 : i32
    %c0_i32_1 = arith.constant 0 : i32
    return %c0_i32, %c0_i32_0 : i32, i32
  }
  func.func @transform_2(%arg0: i32) -> (i32, i32) {
    %c0_i32 = arith.constant 0 : i32
    %c0_i32_0 = arith.constant 0 : i32
    %c0_i32_1 = arith.constant 0 : i32
    return %c0_i32, %c0_i32_0 : i32, i32
  }
  func.func @transform_3(%arg0: i32) -> (i32, i32) {
    %c0_i32 = arith.constant 0 : i32
    %c0_i32_0 = arith.constant 0 : i32
    %c0_i32_1 = arith.constant 0 : i32
    return %c0_i32, %c0_i32_0 : i32, i32
  }
  func.func @transform_4(%arg0: i32) -> (i32, i32) {
    %c0_i32 = arith.constant 0 : i32
    %c0_i32_0 = arith.constant 0 : i32
    %c0_i32_1 = arith.constant 0 : i32
    return %c0_i32, %c0_i32_0 : i32, i32
  }
  func.func @transform_5(%arg0: i32) -> (i32, i32) {
    %c0_i32 = arith.constant 0 : i32
    %c0_i32_0 = arith.constant 0 : i32
    return %arg0, %c0_i32 : i32, i32
  }
}

</mosaic_0001>

<bundles_post_ra>
// kernel: nonlinear_head.1
= control target key start
LH: loop header
LB: loop body
LE: loop exit
PB: predicated region body
PF: predicated region fallthrough
CT: control target
= control target key end

     0   :  { %s812_s1 = inlined_call_operand.vmem [shape: f32[256,256], index: 1, kind: input, shape index: {}]   ;;  %s813_s0 = inlined_call_operand.vmem [shape: f32[8,256], index: 0, kind: input, shape index: {}]   ;;  %s814_s3 = inlined_call_operand.vmem [shape: f32[256,128], index: 3, kind: input, shape index: {}]   ;;  %s815_s2 = inlined_call_operand.vmem [shape: f32[1,256], index: 2, kind: input, shape index: {}]   ;;  %s816_s4 = inlined_call_operand.vmem [shape: f32[1,128], index: 4, kind: input, shape index: {}]   ;;  %s817_s5 = inlined_call_operand.vmem [shape: f32[8,128], index: 5, kind: output, shape index: {}]  }
   0x1   :  { %v23_v0 = vld [vmem:[%s812_s1 + $0x8] sm:$0xff]  ;;  %v25_v1 = vld [vmem:[%s812_s1 + $0x18] sm:$0xff]  ;;  %v22_v2 = vld [vmem:[%s812_s1] sm:$0xff] }
   0x2   :  { %v373_v3 = vpack.c.bf16 %v25_v1, %v23_v0  ;;  %v24_v4 = vld [vmem:[%s812_s1 + $0x10] sm:$0xff]  ;;  %v27_v5 = vld [vmem:[%s812_s1 + $0x28] sm:$0xff]  ;;  %v29_v6 = vld [vmem:[%s812_s1 + $0x38] sm:$0xff] }
   0x3   :  { %v375_v7 = vpack.c.bf16 %v24_v4, %v22_v2  ;;  %v377_v8 = vpack.c.bf16 %v29_v6, %v27_v5  ;;  %v26_v9 = vld [vmem:[%s812_s1 + $0x20] sm:$0xff]  ;;  %v28_v10 = vld [vmem:[%s812_s1 + $0x30] sm:$0xff]  ;;  %v31_v11 = vld [vmem:[%s812_s1 + $0x48] sm:$0xff] }
   0x4   :  { %374 = vmatprep.subr.bf16.mxu0 %v373_v3  ;;  %v33_v12 = vld [vmem:[%s812_s1 + $0x58] sm:$0xff]  ;;  %v379_v13 = vpack.c.bf16 %v28_v10, %v26_v9  ;;  %v30_v15 = vld [vmem:[%s812_s1 + $0x40] sm:$0xff]  ;;  %v32_v16 = vld [vmem:[%s812_s1 + $0x50] sm:$0xff] }
   0x5   :  { %376 = vmatpush1.bf16.msra.mxu0 %v375_v7  ;;  %v381_v14 = vpack.c.bf16 %v33_v12, %v31_v11  ;;  %v35_v17 = vld [vmem:[%s812_s1 + $0x68] sm:$0xff]  ;;  %v37_v18 = vld [vmem:[%s812_s1 + $0x78] sm:$0xff]  ;;  %v383_v19 = vpack.c.bf16 %v32_v16, %v30_v15  ;;  %v34_v21 = vld [vmem:[%s812_s1 + $0x60] sm:$0xff] }
   0x6   :  { %378 = vmatprep.subr.bf16.mxu0 %v377_v8  ;;  %v385_v20 = vpack.c.bf16 %v37_v18, %v35_v17  ;;  %v36_v22 = vld [vmem:[%s812_s1 + $0x70] sm:$0xff]  ;;  %v39_v23 = vld [vmem:[%s812_s1 + $0x88] sm:$0xff]  ;;  %v41_v24 = vld [vmem:[%s812_s1 + $0x98] sm:$0xff] }
   0x7   :  { %v387_v25 = vpack.c.bf16 %v36_v22, %v34_v21  ;;  %v389_v26 = vpack.c.bf16 %v41_v24, %v39_v23  ;;  %v38_v27 = vld [vmem:[%s812_s1 + $0x80] sm:$0xff]  ;;  %v40_v28 = vld [vmem:[%s812_s1 + $0x90] sm:$0xff]  ;;  %v43_v29 = vld [vmem:[%s812_s1 + $0xa8] sm:$0xff] }
   0x8   :  { %v45_v30 = vld [vmem:[%s812_s1 + $0xb8] sm:$0xff]  ;;  %v391_v31 = vpack.c.bf16 %v40_v28, %v38_v27  ;;  %v42_v33 = vld [vmem:[%s812_s1 + $0xa0] sm:$0xff]  ;;  %v44_v34 = vld [vmem:[%s812_s1 + $0xb0] sm:$0xff] }
   0x9   :  { %380 = vmatpush1.bf16.msra.mxu0 %v379_v13  ;;  %v393_v32 = vpack.c.bf16 %v45_v30, %v43_v29  ;;  %v47_v35 = vld [vmem:[%s812_s1 + $0xc8] sm:$0xff]  ;;  %v49_v36 = vld [vmem:[%s812_s1 + $0xd8] sm:$0xff]  ;;  %v395_v37 = vpack.c.bf16 %v44_v34, %v42_v33  ;;  %v46_v39 = vld [vmem:[%s812_s1 + $0xc0] sm:$0xff] }
   0xa   :  { %382 = vmatprep.subr.bf16.mxu0 %v381_v14  ;;  %v397_v38 = vpack.c.bf16 %v49_v36, %v47_v35  ;;  %v48_v40 = vld [vmem:[%s812_s1 + $0xd0] sm:$0xff]  ;;  %v21_v41 = vld [vmem:[%s813_s0 + $0x8] sm:$0xff]  ;;  %v53_v43 = vld [vmem:[%s812_s1 + $0xf8] sm:$0xff] }
   0xb   :  { %v51_v42 = vld [vmem:[%s812_s1 + $0xe8] sm:$0xff]  ;;  %162 = vmatprep.mubr.f32.mxu0 %v21_v41  ;;  %v399_v44 = vpack.c.bf16 %v48_v40, %v46_v39  ;;  %v50_v46 = vld [vmem:[%s812_s1 + $0xe0] sm:$0xff]  ;;  %v52_v47 = vld [vmem:[%s812_s1 + $0xf0] sm:$0xff] }
   0xc   :  { %v401_v45 = vpack.c.bf16 %v53_v43, %v51_v42  ;;  %v55_v48 = vld [vmem:[%s812_s1 + $0x108] sm:$0xff]  ;;  %v57_v49 = vld [vmem:[%s812_s1 + $0x118] sm:$0xff]  ;;  %v403_v50 = vpack.c.bf16 %v52_v47, %v50_v46  ;;  %v54_v52 = vld [vmem:[%s812_s1 + $0x100] sm:$0xff] }
   0xd   :  { %384 = vmatpush1.bf16.msra.mxu0 %v383_v19  ;;  %v405_v51 = vpack.c.bf16 %v57_v49, %v55_v48  ;;  %v56_v53 = vld [vmem:[%s812_s1 + $0x110] sm:$0xff]  ;;  %v59_v54 = vld [vmem:[%s812_s1 + $0x128] sm:$0xff]  ;;  %v61_v55 = vld [vmem:[%s812_s1 + $0x138] sm:$0xff] }
   0xe   :  { %386 = vmatprep.subr.bf16.mxu0 %v385_v20  ;;  %v407_v56 = vpack.c.bf16 %v56_v53, %v54_v52  ;;  %v409_v57 = vpack.c.bf16 %v61_v55, %v59_v54  ;;  %v58_v58 = vld [vmem:[%s812_s1 + $0x120] sm:$0xff]  ;;  %v60_v59 = vld [vmem:[%s812_s1 + $0x130] sm:$0xff]  ;;  %v63_v60 = vld [vmem:[%s812_s1 + $0x148] sm:$0xff] }
   0xf   :  { %v65_v61 = vld [vmem:[%s812_s1 + $0x158] sm:$0xff]  ;;  %v411_v62 = vpack.c.bf16 %v60_v59, %v58_v58  ;;  %v62_v0 = vld [vmem:[%s812_s1 + $0x140] sm:$0xff]  ;;  %v64_v1 = vld [vmem:[%s812_s1 + $0x150] sm:$0xff] }
  0x10   :  { %v413_v63 = vpack.c.bf16 %v65_v61, %v63_v60  ;;  %v67_v2 = vld [vmem:[%s812_s1 + $0x168] sm:$0xff]  ;;  %v69_v3 = vld [vmem:[%s812_s1 + $0x178] sm:$0xff]  ;;  %v415_v4 = vpack.c.bf16 %v64_v1, %v62_v0  ;;  %v66_v6 = vld [vmem:[%s812_s1 + $0x160] sm:$0xff] }
  0x11   :  { %388 = vmatpush1.bf16.msra.mxu0 %v387_v25  ;;  %v417_v5 = vpack.c.bf16 %v69_v3, %v67_v2  ;;  %v68_v7 = vld [vmem:[%s812_s1 + $0x170] sm:$0xff]  ;;  %v71_v8 = vld [vmem:[%s812_s1 + $0x188] sm:$0xff]  ;;  %v73_v9 = vld [vmem:[%s812_s1 + $0x198] sm:$0xff] }
  0x12   :  { %390 = vmatprep.subr.bf16.mxu0 %v389_v26  ;;  %v419_v10 = vpack.c.bf16 %v68_v7, %v66_v6  ;;  %v421_v11 = vpack.c.bf16 %v73_v9, %v71_v8  ;;  %v70_v12 = vld [vmem:[%s812_s1 + $0x180] sm:$0xff]  ;;  %v72_v13 = vld [vmem:[%s812_s1 + $0x190] sm:$0xff]  ;;  %v75_v14 = vld [vmem:[%s812_s1 + $0x1a8] sm:$0xff] }
  0x13   :  { %v77_v15 = vld [vmem:[%s812_s1 + $0x1b8] sm:$0xff]  ;;  %v423_v16 = vpack.c.bf16 %v72_v13, %v70_v12  ;;  %v74_v18 = vld [vmem:[%s812_s1 + $0x1a0] sm:$0xff]  ;;  %v76_v19 = vld [vmem:[%s812_s1 + $0x1b0] sm:$0xff] }
  0x14   :  { %v425_v17 = vpack.c.bf16 %v77_v15, %v75_v14  ;;  %v79_v20 = vld [vmem:[%s812_s1 + $0x1c8] sm:$0xff]  ;;  %v81_v21 = vld [vmem:[%s812_s1 + $0x1d8] sm:$0xff]  ;;  %v427_v22 = vpack.c.bf16 %v76_v19, %v74_v18  ;;  %v78_v24 = vld [vmem:[%s812_s1 + $0x1c0] sm:$0xff]  ;;  %v88_v18 = vlaneseq }
  0x15   :  { %392 = vmatpush1.bf16.msra.mxu0 %v391_v31  ;;  %v429_v23 = vpack.c.bf16 %v81_v21, %v79_v20  ;;  %v80_v25 = vld [vmem:[%s812_s1 + $0x1d0] sm:$0xff]  ;;  %v83_v26 = vld [vmem:[%s812_s1 + $0x1e8] sm:$0xff]  ;;  %v85_v27 = vld [vmem:[%s812_s1 + $0x1f8] sm:$0xff] }
  0x16   :  { %394 = vmatprep.subr.bf16.mxu0 %v393_v32  ;;  %v431_v28 = vpack.c.bf16 %v80_v25, %v78_v24  ;;  %v433_v29 = vpack.c.bf16 %v85_v27, %v83_v26  ;;  %v82_v30 = vld [vmem:[%s812_s1 + $0x1e0] sm:$0xff]  ;;  %v84_v31 = vld [vmem:[%s812_s1 + $0x1f0] sm:$0xff]  ;;  %v240_v35 = vld [vmem:[%s814_s3 + $0x88] sm:$0xff]  ;;  %v89_v19 = vshrl.u32 %v88_v18, 7 }
  0x17   :  { %v435_v32 = vpack.c.bf16 %v84_v31, %v82_v30  ;;  %v20_v33 = vld [vmem:[%s813_s0] sm:$0xff]  ;;  %v241_v39 = vld [vmem:[%s814_s3 + $0x90] sm:$0xff]  ;;  %v242_v40 = vld [vmem:[%s814_s3 + $0x98] sm:$0xff] }
  0x18   :  { %v239_v34 = vld [vmem:[%s814_s3 + $0x80] sm:$0xff]  ;;  %v441_v42 = vpack.c.bf16 %v242_v40, %v241_v39  ;;  %v225_v43 = vld [vmem:[%s814_s3 + $0x10] sm:$0xff]  ;;  %v244_v46 = vld [vmem:[%s814_s3 + $0xa8] sm:$0xff]  ;;  %v90_v20 = vsub.s32 0, %v89_v19 }
  0x19   :  { %396 = vmatpush1.bf16.msra.mxu0 %v395_v37  ;;  %v223_v36 = vld [vmem:[%s814_s3] sm:$0xff]  ;;  %v437_v37 = vpack.c.bf16 %v240_v35, %v239_v34  ;;  %v246_v52 = vld [vmem:[%s814_s3 + $0xb8] sm:$0xff]  ;;  %v229_v55 = vld [vmem:[%s814_s3 + $0x30] sm:$0xff] }
  0x1a   :  { %398 = vmatprep.subr.bf16.mxu0 %v397_v38  ;;  %v224_v38 = vld [vmem:[%s814_s3 + $0x8] sm:$0xff]  ;;  %v227_v49 = vld [vmem:[%s814_s3 + $0x20] sm:$0xff]  ;;  %v250_v0 = vld [vmem:[%s814_s3 + $0xd8] sm:$0xff] }
  0x1b   :  { %v439_v41 = vpack.c.bf16 %v224_v38, %v223_v36  ;;  %438 = vmatprep.subr.bf16.mxu1 %v437_v37  ;;  %v248_v58 = vld [vmem:[%s814_s3 + $0xc8] sm:$0xff]  ;;  %v231_v61 = vld [vmem:[%s814_s3 + $0x40] sm:$0xff]  ;;  %v233_v3 = vld [vmem:[%s814_s3 + $0x50] sm:$0xff] }
  0x1c   :  { %v252_v6 = vld [vmem:[%s814_s3 + $0xe8] sm:$0xff]  ;;  %v235_v9 = vld [vmem:[%s814_s3 + $0x60] sm:$0xff]  ;;  %v254_v12 = vld [vmem:[%s814_s3 + $0xf8] sm:$0xff] }
  0x1d   :  { %400 = vmatpush1.bf16.msra.mxu0 %v399_v44  ;;  %v226_v44 = vld [vmem:[%s814_s3 + $0x18] sm:$0xff]  ;;  %440 = vmatpush3.bf16.msra.mxu1 %v439_v41  ;;  %v237_v15 = vld [vmem:[%s814_s3 + $0x70] sm:$0xff]  ;;  %v86_v21 = vld [vmem:[%s815_s2] sm:$0x3] }
  0x1e   :  { %402 = vmatprep.subr.bf16.mxu0 %v401_v45  ;;  %v243_v45 = vld [vmem:[%s814_s3 + $0xa0] sm:$0xff]  ;;  %v443_v47 = vpack.c.bf16 %v226_v44, %v225_v43  ;;  %442 = vmatprep.subr.bf16.mxu1 %v441_v42 }
  0x1f   :  { %v445_v48 = vpack.c.bf16 %v244_v46, %v243_v45 }
  0x21   :  { %404 = vmatpush1.bf16.msra.mxu0 %v403_v50  ;;  %v228_v50 = vld [vmem:[%s814_s3 + $0x28] sm:$0xff]  ;;  %444 = vmatpush3.bf16.msra.mxu1 %v443_v47 }
  0x22   :  { %406 = vmatprep.subr.bf16.mxu0 %v405_v51  ;;  %v245_v51 = vld [vmem:[%s814_s3 + $0xb0] sm:$0xff]  ;;  %v447_v53 = vpack.c.bf16 %v228_v50, %v227_v49  ;;  %446 = vmatprep.subr.bf16.mxu1 %v445_v48 }
  0x23   :  { %v449_v54 = vpack.c.bf16 %v246_v52, %v245_v51 }
  0x25   :  { %408 = vmatpush1.bf16.msra.mxu0 %v407_v56  ;;  %v230_v56 = vld [vmem:[%s814_s3 + $0x38] sm:$0xff]  ;;  %448 = vmatpush3.bf16.msra.mxu1 %v447_v53 }
  0x26   :  { %410 = vmatprep.subr.bf16.mxu0 %v409_v57  ;;  %v247_v57 = vld [vmem:[%s814_s3 + $0xc0] sm:$0xff]  ;;  %v451_v59 = vpack.c.bf16 %v230_v56, %v229_v55  ;;  %450 = vmatprep.subr.bf16.mxu1 %v449_v54 }
  0x27   :  { %v453_v60 = vpack.c.bf16 %v248_v58, %v247_v57 }
  0x29   :  { %412 = vmatpush1.bf16.msra.mxu0 %v411_v62  ;;  %v232_v62 = vld [vmem:[%s814_s3 + $0x48] sm:$0xff]  ;;  %452 = vmatpush3.bf16.msra.mxu1 %v451_v59 }
  0x2a   :  { %414 = vmatprep.subr.bf16.mxu0 %v413_v63  ;;  %v249_v63 = vld [vmem:[%s814_s3 + $0xd0] sm:$0xff]  ;;  %v455_v1 = vpack.c.bf16 %v232_v62, %v231_v61  ;;  %454 = vmatprep.subr.bf16.mxu1 %v453_v60 }
  0x2b   :  { %v457_v2 = vpack.c.bf16 %v250_v0, %v249_v63 }
  0x2d   :  { %416 = vmatpush1.bf16.msra.mxu0 %v415_v4  ;;  %v234_v4 = vld [vmem:[%s814_s3 + $0x58] sm:$0xff]  ;;  %456 = vmatpush3.bf16.msra.mxu1 %v455_v1 }
  0x2e   :  { %418 = vmatprep.subr.bf16.mxu0 %v417_v5  ;;  %v251_v5 = vld [vmem:[%s814_s3 + $0xe0] sm:$0xff]  ;;  %v459_v7 = vpack.c.bf16 %v234_v4, %v233_v3  ;;  %458 = vmatprep.subr.bf16.mxu1 %v457_v2  ;;  %v478_v4 = vmov 1.0  }
  0x2f   :  { %v461_v8 = vpack.c.bf16 %v252_v6, %v251_v5 }
  0x31   :  { %420 = vmatpush1.bf16.msra.mxu0 %v419_v10  ;;  %v236_v10 = vld [vmem:[%s814_s3 + $0x68] sm:$0xff]  ;;  %460 = vmatpush3.bf16.msra.mxu1 %v459_v7 }
  0x32   :  { %422 = vmatprep.subr.bf16.mxu0 %v421_v11  ;;  %v253_v11 = vld [vmem:[%s814_s3 + $0xf0] sm:$0xff]  ;;  %v463_v13 = vpack.c.bf16 %v236_v10, %v235_v9  ;;  %462 = vmatprep.subr.bf16.mxu1 %v461_v8 }
  0x33   :  { %v465_v14 = vpack.c.bf16 %v254_v12, %v253_v11 }
  0x35   :  { %424 = vmatpush1.bf16.msra.mxu0 %v423_v16  ;;  %v238_v16 = vld [vmem:[%s814_s3 + $0x78] sm:$0xff]  ;;  %464 = vmatpush3.bf16.msra.mxu1 %v463_v13 }
  0x36   :  { %426 = vmatprep.subr.bf16.mxu0 %v425_v17  ;;  %v467_v17 = vpack.c.bf16 %v238_v16, %v237_v15  ;;  %466 = vmatprep.subr.bf16.mxu1 %v465_v14 }
  0x39   :  { %428 = vmatpush1.bf16.msra.mxu0 %v427_v22  ;;  %468 = vmatpush3.bf16.msra.mxu1 %v467_v17  ;;  %v94_v22 = vsub.s32 1, %v89_v19  ;;  %v337_v17 = vld [vmem:[%s816_s4] ss:$0 sm:$0xff] }
  0x3a   :  { %430 = vmatprep.subr.bf16.mxu0 %v429_v23  ;;  %v91_v23 = vrot.slane %v86_v21, %v90_v20 }
  0x3b   :  { %v95_v24 = vrot.slane %v86_v21, %v94_v22 }
  0x3d   :  { %432 = vmatpush1.bf16.msra.mxu0 %v431_v28 }
  0x3e   :  { %434 = vmatprep.subr.bf16.mxu0 %v433_v29 }
  0x41   :  { %436 = vmatpush1.bf16.msra.mxu0 %v435_v32 }
  0x44   :  { %163 = vmatmul.mubr.f32.vlgmr.msra.gmra.mrb[0].mxu0 %v20_v33 }
 0x117   :  { %v164_v25 = vpop.f32.mrb[0].mxu0 }
 0x118   :  { %v165_v26 = vadd.f32 %v164_v25, %v91_v23  ;;  %v166_v27 = vpop.f32.mrb[1].mxu0 }
 0x119   :  { %v167_v28 = vadd.f32 %v166_v27, %v95_v24 }
 0x11a   :  { %v171_v29 = vmul.f32 0.70710677, %v165_v26  ;;  %v169_v13 = vmul.f32 0.5, %v165_v26 }
 0x11b   :  { %v172_v30 = vmul.f32 0.70710677, %v167_v28  ;;  %v170_v11 = vmul.f32 0.5, %v167_v28 }
 0x11c   :  { %v177_v31 = vand.u32 2147483647, %v171_v29  ;;  %vm173_vm0 = vcmp.lt.f32.partialorder %v171_v29, 0.0 }
 0x11d   :  { %v178_v32 = vand.u32 2147483647, %v172_v30  ;;  %vm174_vm1 = vcmp.lt.f32.partialorder %v172_v30, 0.0  ;;  %v175_v5 = vsel %vm173_vm0, -1.0, %v478_v4 }
 0x11e   :  { %v179_v33 = vmul.f32 0.3275911, %v177_v31  ;;  %v205_v37 = vsub.f32 0.0, %v177_v31  ;;  %v176_v7 = vsel %vm174_vm1, -1.0, %v478_v4 }
 0x11f   :  { %v180_v34 = vmul.f32 0.3275911, %v178_v32  ;;  %v206_v38 = vsub.f32 0.0, %v178_v32 }
 0x120   :  { %v181_v35 = vadd.f32 1.0, %v179_v33  ;;  %v207_v40 = vmul.f32 %v205_v37, %v177_v31 }
 0x121   :  { %v182_v36 = vadd.f32 1.0, %v180_v34  ;;  %v208_v42 = vmul.f32 %v206_v38, %v178_v32 }
 0x122   :  { %470 = vrcp.f32 %v181_v35  ;;  %v209_v46 = vmul.f32 1.442695, %v207_v40 }
 0x123   :  { %472 = vrcp.f32 %v182_v36  ;;  %v211_v48 = vmul.f32 1.442695, %v208_v42 }
 0x124   :  { %474 = vpow2.f32 %v209_v46 }
 0x125   :  { %476 = vpow2.f32 %v211_v48 }
 0x12c   :  { %v471_v39 = vpop.eup %470 }
 0x12d   :  { %v473_v41 = vpop.eup %472  ;;  %v187_v43 = vmul.f32 1.0614054, %v471_v39 }
 0x12e   :  { %v188_v44 = vmul.f32 1.0614054, %v473_v41  ;;  %v475_v62 = vpop.eup %474 }
 0x12f   :  { %v189_v45 = vadd.f32 -1.4531521, %v187_v43  ;;  %v477_v0 = vpop.eup %476 }
 0x130   :  { %v190_v47 = vadd.f32 -1.4531521, %v188_v44 }
 0x131   :  { %v191_v49 = vmul.f32 %v471_v39, %v189_v45 }
 0x132   :  { %v192_v50 = vmul.f32 %v473_v41, %v190_v47 }
 0x133   :  { %v193_v51 = vadd.f32 1.4214138, %v191_v49 }
 0x134   :  { %v194_v52 = vadd.f32 1.4214138, %v192_v50 }
 0x135   :  { %v195_v53 = vmul.f32 %v471_v39, %v193_v51 }
 0x136   :  { %v196_v54 = vmul.f32 %v473_v41, %v194_v52 }
 0x137   :  { %v197_v55 = vadd.f32 -0.28449672, %v195_v53 }
 0x138   :  { %v198_v56 = vadd.f32 -0.28449672, %v196_v54 }
 0x139   :  { %v199_v57 = vmul.f32 %v471_v39, %v197_v55 }
 0x13a   :  { %v200_v58 = vmul.f32 %v473_v41, %v198_v56 }
 0x13b   :  { %v201_v59 = vadd.f32 0.2548296, %v199_v57 }
 0x13c   :  { %v202_v60 = vadd.f32 0.2548296, %v200_v58 }
 0x13d   :  { %v203_v61 = vmul.f32 %v471_v39, %v201_v59 }
 0x13e   :  { %v204_v63 = vmul.f32 %v473_v41, %v202_v60 }
 0x13f   :  { %v213_v1 = vmul.f32 %v475_v62, %v203_v61 }
 0x140   :  { %v214_v2 = vmul.f32 %v477_v0, %v204_v63 }
 0x141   :  { %v215_v3 = vsub.f32 1.0, %v213_v1 }
 0x142   :  { %v216_v6 = vsub.f32 1.0, %v214_v2 }
 0x143   :  { %v217_v8 = vmul.f32 %v215_v3, %v175_v5 }
 0x144   :  { %v218_v9 = vmul.f32 %v216_v6, %v176_v7 }
 0x145   :  { %v219_v10 = vadd.f32 1.0, %v217_v8 }
 0x146   :  { %v220_v12 = vadd.f32 1.0, %v218_v9 }
 0x147   :  { %v221_v15 = vmul.f32 %v219_v10, %v169_v13 }
 0x148   :  { %v222_v14 = vmul.f32 %v220_v12, %v170_v11 }
 0x14a   :  { %326 = vmatprep.mubr.f32.mxu1 %v222_v14 }
 0x14b   :  { %327 = vmatmul.mubr.f32.vlgmr.msra.gmra.mrb[0].mxu1 %v221_v15 }
 0x21e   :  { %v370_v16 = vpop.f32.mrb[0].mxu1 }
 0x21f   :  { %v371_v18 = vpop.f32.mrb[1].mxu1 }
 0x220   :  { %v372_v19 = vadd.f32 %v371_v18, %v370_v16 }
 0x222   :  { %v329_v20 = vadd.f32 %v372_v19, %v337_v17 }
 0x224   :  { %332 = vst [vmem:[%s817_s5] sm:$0xff] %v329_v20 }

</bundles_post_ra>
